<compile_context>
chip_gen: v7x
topology: tpu7x:2x2x1
jax: 0.10.0
libtpu: 0.0.40
codegen_flags: <defaults>
</compile_context>

<pallas_src>
import jax
import jax.numpy as jnp
from jax import lax
from jax.experimental import pallas as pl
from jax.experimental.pallas import tpu as pltpu


def _affine_kernel(coef_ref, p_ref, o_ref):
    # coef_ref: (tb, 6, 384) f32  per-batch, lane-periodic affine coefficients
    # p_ref   : (tb, ntb, 384)    128 points x 3 interleaved coords per chunk
    # o_ref   : (tb, ntb, 384)
    pv = p_ref[...].astype(jnp.float32)
    cf = coef_ref[...]

    # out[m] = bias + A[j,j]*p[m] + A[j+1,j]*p[m+1] + A[j+2,j]*p[m+2]
    #               + A[j-1,j]*p[m-1] + A[j-2,j]*p[m-2]       (j = m % 3)
    # Shifts use non-negative amounts (383 == -1 mod 384, 382 == -2 mod 384);
    # coefficients are zero on the lanes where the circular roll wraps.
    out = cf[:, 5:6, :] + cf[:, 0:1, :] * pv
    out = out + cf[:, 1:2, :] * pltpu.roll(pv, 383, axis=2)   # source lane m+1
    out = out + cf[:, 2:3, :] * pltpu.roll(pv, 382, axis=2)   # source lane m+2
    out = out + cf[:, 3:4, :] * pltpu.roll(pv, 1, axis=2)     # source lane m-1
    out = out + cf[:, 4:5, :] * pltpu.roll(pv, 2, axis=2)     # source lane m-2
    o_ref[...] = out.astype(o_ref.dtype)


def _pick_batch_block(B, cap):
    """Largest divisor of B that is <= cap (batch elements per grid step)."""
    # TODO(synk): for prime/awkward large B this degrades to tb=1; padding B
    # (with masked tail) would keep steps large, but is rarely needed here.
    for tb in range(min(B, cap), 0, -1):
        if B % tb == 0:
            return tb
    return 1


def _pick_chunk_block(n_chunks, tb, itemsize, target_bytes):
    """Pick the number of 384-wide chunks per block and the padded chunk count.

    Returns (ntb, n_pad): ntb is either the full (padded) chunk count or a
    multiple of 8 that divides it, sized so one p block is ~target_bytes.
    """
    per_chunk = tb * 384 * itemsize
    max_chunks = max(8, int(target_bytes // per_chunk))
    if n_chunks <= max_chunks:
        return n_chunks, n_chunks
    ntb = (max_chunks // 8) * 8
    n_pad = ((n_chunks + ntb - 1) // ntb) * ntb
    return ntb, n_pad


def affine_layer_pallas(x, p, wa, ba, wb, bb, *,
                        batch_block_cap=8,
                        target_block_bytes=2 * 1024 * 1024):
    """x: (B, C), p: (B, T, 3), wa: (9, C), ba: (9,), wb: (3, C), bb: (3,)."""
    B, C = x.shape
    Bp, T, dim = p.shape
    assert Bp == B and dim == 3

    # ---- hoisted fc_A / fc_b: one tiny (B, C) @ (C, 12) matmul in XLA ----
    w_fused = jnp.concatenate([wa, wb], axis=0).T.astype(jnp.float32)   # (C, 12)
    b_fused = jnp.concatenate([ba, bb]).astype(jnp.float32)             # (12,)
    y = jnp.dot(x.astype(jnp.float32), w_fused,
                precision=lax.Precision.HIGHEST) + b_fused              # (B, 12)
    A = y[:, :9].reshape(B, 3, 3)                                       # A[b, k, j]
    bv = y[:, 9:12]                                                     # (B, 3)

    # Lane-periodic coefficient vectors for the 384-lane chunks (j = lane % 3).
    j_idx = jnp.arange(384) % 3

    def a_coef(d):
        k = j_idx + d
        valid = (k >= 0) & (k < 3)
        c = A[:, jnp.clip(k, 0, 2), j_idx]                              # (B, 384)
        return jnp.where(valid[None, :], c, 0.0)

    coef = jnp.stack(
        [a_coef(0), a_coef(1), a_coef(2), a_coef(-1), a_coef(-2), bv[:, j_idx]],
        axis=1).astype(jnp.float32)                                     # (B, 6, 384)

    # ---- tiling ----
    itemsize = p.dtype.itemsize
    tb = _pick_batch_block(B, batch_block_cap)
    n_chunks = -(-T // 128)
    ntb, n_pad = _pick_chunk_block(n_chunks, tb, itemsize, target_block_bytes)
    Tp = n_pad * 128

    p_pad = p if Tp == T else jnp.pad(p, ((0, 0), (0, Tp - T), (0, 0)))
    p_chunks = p_pad.reshape(B, n_pad, 384)          # contiguous (free) reshape

    grid = (B // tb, n_pad // ntb)
    flops = 21 * B * T                               # 9 mul + 9 add + 3 add / point
    bytes_accessed = B * Tp * 3 * 2 * itemsize + coef.size * 4

    out_chunks = pl.pallas_call(
        _affine_kernel,
        out_shape=jax.ShapeDtypeStruct((B, n_pad, 384), p.dtype),
        grid=grid,
        in_specs=[
            pl.BlockSpec((tb, 6, 384), lambda i, j: (i, 0, 0)),     # coef
            pl.BlockSpec((tb, ntb, 384), lambda i, j: (i, j, 0)),   # p (chunked)
        ],
        out_specs=pl.BlockSpec((tb, ntb, 384), lambda i, j: (i, j, 0)),
        compiler_params=pltpu.CompilerParams(
            dimension_semantics=("parallel", "parallel"),
            vmem_limit_bytes=32 * 1024 * 1024),
        cost_estimate=pl.CostEstimate(flops=flops, transcendentals=0,
                                      bytes_accessed=bytes_accessed),
    )(coef, p_chunks)

    out = out_chunks.reshape(B, Tp, 3)               # contiguous (free) reshape
    return out if Tp == T else out[:, :T, :]


def affine_layer_ref(x, p, wa, ba, wb, bb):
    """Pure-JAX reference mirroring the PyTorch forward (full f32 precision)."""
    B = x.shape[0]
    A = (jnp.dot(x, wa.T, precision=lax.Precision.HIGHEST) + ba).reshape(B, 3, 3)
    b = (jnp.dot(x, wb.T, precision=lax.Precision.HIGHEST) + bb).reshape(B, 1, 3)
    return jnp.matmul(p, A, precision=lax.Precision.HIGHEST) + b


if __name__ == "__main__":
    def run_case(key, B, T, c_dim, **kwargs):
        kx, kp, kwa, kwb = jax.random.split(key, 4)
        x = jax.random.normal(kx, (B, c_dim), dtype=jnp.float32)
        p = jax.random.normal(kp, (B, T, 3), dtype=jnp.float32)
        # nn.Linear(c_dim, 9) / nn.Linear(c_dim, 3): reset_parameters() zeros
        # the weights and sets biases to eye(3).flatten() / [0, 0, 2]; keep
        # those biases but use small random weights to exercise the full path.
        wa = 0.1 * jax.random.normal(kwa, (9, c_dim), dtype=jnp.float32)
        wb = 0.1 * jax.random.normal(kwb, (3, c_dim), dtype=jnp.float32)
        ba = jnp.eye(3, dtype=jnp.float32).reshape(-1)
        bb = jnp.array([0.0, 0.0, 2.0], dtype=jnp.float32)

        out = jax.block_until_ready(
            affine_layer_pallas(x, p, wa, ba, wb, bb, **kwargs))
        ref = affine_layer_ref(x, p, wa, ba, wb, bb)
        assert out.shape == (B, T, 3), out.shape
        assert jnp.allclose(out, ref, atol=1e-4, rtol=1e-4), (
            float(jnp.max(jnp.abs(out - ref))))

    key = jax.random.PRNGKey(0)
    k1, k2, k3 = jax.random.split(key, 3)
    # Spec-sized tiny case (T padded 8 -> 128, single block).
    run_case(k1, B=2, T=8, c_dim=32)
    # Multiple T tiles + chunk padding (10 chunks -> 16, grid (1, 2)).
    run_case(k2, B=4, T=1280, c_dim=16, target_block_bytes=32 * 1024)
    # Ragged T (200 -> 256) and odd batch size.
    run_case(k3, B=3, T=200, c_dim=8)

    print("KERNEL_OK")
</pallas_src>

<mosaic_0001>
module attributes {stable_mosaic.version = 11 : i64} {
  func.func @_affine_kernel(%arg0: i32, %arg1: i32, %arg2: memref<2x6x384xf32, #tpu.memory_space<vmem>>, %arg3: memref<2x1x384xf32, #tpu.memory_space<vmem>>, %arg4: memref<2x1x384xf32, #tpu.memory_space<vmem>>) attributes {dimension_semantics = [#tpu.dimension_semantics<parallel>, #tpu.dimension_semantics<parallel>], iteration_bounds = array<i64: 1, 1>, scalar_prefetch = 0 : i64, scratch_operands = 0 : i64, tpu.core_type = #tpu.core_type<tc>, window_params = [{transform_indices = @transform_0, window_bounds = array<i64: 2, 6, 384>}, {transform_indices = @transform_1, window_bounds = array<i64: 2, 1, 384>}, {transform_indices = @transform_2, window_bounds = array<i64: 2, 1, 384>}]} {
    %c0 = arith.constant 0 : index
    %c0_0 = arith.constant 0 : index
    %c0_1 = arith.constant 0 : index
    %0 = vector.load %arg3[%c0, %c0_0, %c0_1] : memref<2x1x384xf32, #tpu.memory_space<vmem>>, vector<2x1x384xf32>
    %c0_2 = arith.constant 0 : index
    %c0_3 = arith.constant 0 : index
    %c0_4 = arith.constant 0 : index
    %1 = vector.load %arg2[%c0_2, %c0_3, %c0_4] : memref<2x6x384xf32, #tpu.memory_space<vmem>>, vector<2x6x384xf32>
    %2 = vector.extract_strided_slice %1 {offsets = [0, 5, 0], sizes = [2, 1, 384], strides = [1, 1, 1]} : vector<2x6x384xf32> to vector<2x1x384xf32>
    %3 = vector.extract_strided_slice %1 {offsets = [0, 0, 0], sizes = [2, 1, 384], strides = [1, 1, 1]} : vector<2x6x384xf32> to vector<2x1x384xf32>
    %4 = arith.mulf %3, %0 : vector<2x1x384xf32>
    %5 = arith.addf %2, %4 : vector<2x1x384xf32>
    %6 = vector.extract_strided_slice %1 {offsets = [0, 1, 0], sizes = [2, 1, 384], strides = [1, 1, 1]} : vector<2x6x384xf32> to vector<2x1x384xf32>
    %c383_i32 = arith.constant 383 : i32
    %7 = tpu.dynamic_rotate %0 by %c383_i32 dim 2 : vector<2x1x384xf32>, i32 -> vector<2x1x384xf32>
    %8 = arith.mulf %6, %7 : vector<2x1x384xf32>
    %9 = arith.addf %5, %8 : vector<2x1x384xf32>
    %10 = vector.extract_strided_slice %1 {offsets = [0, 2, 0], sizes = [2, 1, 384], strides = [1, 1, 1]} : vector<2x6x384xf32> to vector<2x1x384xf32>
    %c382_i32 = arith.constant 382 : i32
    %11 = tpu.dynamic_rotate %0 by %c382_i32 dim 2 : vector<2x1x384xf32>, i32 -> vector<2x1x384xf32>
    %12 = arith.mulf %10, %11 : vector<2x1x384xf32>
    %13 = arith.addf %9, %12 : vector<2x1x384xf32>
    %14 = vector.extract_strided_slice %1 {offsets = [0, 3, 0], sizes = [2, 1, 384], strides = [1, 1, 1]} : vector<2x6x384xf32> to vector<2x1x384xf32>
    %c1_i32 = arith.constant 1 : i32
    %15 = tpu.dynamic_rotate %0 by %c1_i32 dim 2 : vector<2x1x384xf32>, i32 -> vector<2x1x384xf32>
    %16 = arith.mulf %14, %15 : vector<2x1x384xf32>
    %17 = arith.addf %13, %16 : vector<2x1x384xf32>
    %18 = vector.extract_strided_slice %1 {offsets = [0, 4, 0], sizes = [2, 1, 384], strides = [1, 1, 1]} : vector<2x6x384xf32> to vector<2x1x384xf32>
    %c2_i32 = arith.constant 2 : i32
    %19 = tpu.dynamic_rotate %0 by %c2_i32 dim 2 : vector<2x1x384xf32>, i32 -> vector<2x1x384xf32>
    %20 = arith.mulf %18, %19 : vector<2x1x384xf32>
    %21 = arith.addf %17, %20 : vector<2x1x384xf32>
    %c0_5 = arith.constant 0 : index
    %c0_6 = arith.constant 0 : index
    %c0_7 = arith.constant 0 : index
    %22 = vector.load %arg4[%c0_5, %c0_6, %c0_7] : memref<2x1x384xf32, #tpu.memory_space<vmem>>, vector<2x1x384xf32>
    tpu.vector_store %arg4[%c0_5, %c0_6, %c0_7], %21 {strides = array<i32>} : memref<2x1x384xf32, #tpu.memory_space<vmem>>, vector<2x1x384xf32>,
    return
  }
  func.func @transform_0(%arg0: i32, %arg1: i32) -> (i32, i32, i32) {
    %c0_i32 = arith.constant 0 : i32
    %c0_i32_0 = arith.constant 0 : i32
    %c0_i32_1 = arith.constant 0 : i32
    return %arg0, %c0_i32, %c0_i32_0 : i32, i32, i32
  }
  func.func @transform_1(%arg0: i32, %arg1: i32) -> (i32, i32, i32) {
    %c0_i32 = arith.constant 0 : i32
    %c0_i32_0 = arith.constant 0 : i32
    return %arg0, %arg1, %c0_i32 : i32, i32, i32
  }
  func.func @transform_2(%arg0: i32, %arg1: i32) -> (i32, i32, i32) {
    %c0_i32 = arith.constant 0 : i32
    %c0_i32_0 = arith.constant 0 : i32
    return %arg0, %arg1, %c0_i32 : i32, i32, i32
  }
}

</mosaic_0001>

<bundles_post_ra>
// kernel: tpu_custom_call.1
= control target key start
LH: loop header
LB: loop body
LE: loop exit
PB: predicated region body
PF: predicated region fallthrough
CT: control target
= control target key end

     0   :  { %v22_v0 = vlaneseq  ;;  %s632_s0 = inlined_call_operand.vmem [shape: f32[2,6,384], index: 0, kind: input, shape index: {}]   ;;  %s633_s1 = inlined_call_operand.vmem [shape: f32[2,1,384], index: 1, kind: input, shape index: {}]   ;;  %s634_s2 = inlined_call_operand.hbm [shape: f32[2,1,384], index: 2, kind: output, shape index: {}]  }
   0x2   :  { %v486_v1 = vshrl.u32 %v22_v0, 7 }
   0x3   :  { %7 = vsyncpa [#allocation3], 0  ;;  %v12_v2 = vld [vmem:[%s633_s1] sm:$0x7]  ;;  %v13_v5 = vld [vmem:[%s633_s1 + $0x3] sm:$0x7] }
   0x4   :  { %v28_v3 = vsub.s32 1, %v486_v1  ;;  %v24_v4 = vsub.s32 0, %v486_v1  ;;  %s462_s13 = smov 127   ;;  %v32_v10 = vsub.s32 2, %v486_v1  ;;  %s463_s14 = smov 126   ;;  %v503_v14 = vand.u32 127, %v22_v0 }
   0x5   :  { %s464_s1 = smov 1   ;;  %s465_s15 = smov 2   ;;  %v500_v13 = vld [vmem:[%s632_s0] sm:$0x3f]  ;;  %v509_v16 = vld [vmem:[%s632_s0 + $0x18] sm:$0x3f] }
   0x6   :  { %v29_v6 = vrot.slane %v12_v2, %v28_v3  ;;  %v25_v7 = vrot.slane %v12_v2, %v24_v4  ;;  %v41_v8 = vrot.slane %v13_v5, %v28_v3  ;;  %v37_v9 = vrot.slane %v13_v5, %v24_v4  ;;  %v515_v17 = vld [vmem:[%s632_s0 + $0x20] sm:$0x3f]  ;;  %v521_v22 = vld [vmem:[%s632_s0 + $0x28] sm:$0x3f]  ;;  %v533_v25 = vld [vmem:[%s632_s0 + $0x10] sm:$0x3f] }
   0x7   :  { %v45_v11 = vrot.slane %v13_v5, %v32_v10  ;;  %v33_v12 = vrot.slane %v12_v2, %v32_v10  ;;  %vm96_vm0 = vcmp.lt.s32.totalorder %v503_v14, 127  ;;  %v526_v23 = vld [vmem:[%s632_s0 + $0x8] sm:$0x3f]  ;;  %vm163_vm1 = vcmp.lt.s32.totalorder %v503_v14, 126  ;;  %s467_s0 = smov [#allocation2]  }
   0x8   :  { %86 = vrot.lane.b32.xlu1 %v29_v6, %s462_s13  ;;  %82 = vrot.lane.b32.xlu0 %v25_v7, %s462_s13  ;;  %v52_v15 = vmul.f32 %v25_v7, %v500_v13  ;;  %v55_v21 = vmul.f32 %v37_v9, %v509_v16  ;;  %v56_v27 = vmul.f32 %v41_v8, %v515_v17  ;;  %vm230_vm2 = vcmp.lt.s32.totalorder %v503_v14, 1  ;;  %s419_s28 = sshll.u32 %s467_s0, 4  ;;  %s420_s28 = int_to_ptr.vmem [resolvable:$true] %s419_s28 }
   0x9   :  { %v57_v28 = vmul.f32 %v45_v11, %v521_v22  ;;  %v53_v29 = vmul.f32 %v29_v6, %v526_v23  ;;  %v54_v35 = vmul.f32 %v33_v12, %v533_v25  ;;  %vm297_vm3 = vcmp.lt.s32.totalorder %v503_v14, 2  ;;  %s438_s29 = scalar_lea.vmem %s420_s28, 96  ;;  %p443_p1 = scmp.lt.s32.totalorder %s420_s28, %s420_s28 }
   0xa   :  { %v64_v20 = vrot.slane %v52_v15, 3  ;;  %v67_v33 = vrot.slane %v55_v21, 3  ;;  %v68_v39 = vrot.slane %v56_v27, 3  ;;  %vm410_vm4 = vcmp.lt.s32.totalorder %v22_v0, 384  ;;  %p439_p0 = scmp.ne.s32.totalorder %s420_s28, %s438_s29  ;;  %p444_p2 = scmp.lt.s32.totalorder %s438_s29, %s438_s29 }
   0xb   :  { %v69_v40 = vrot.slane %v57_v28, 3  ;;  %v65_v41 = vrot.slane %v53_v29, 3  ;;  %v66_v46 = vrot.slane %v54_v35, 3 }
   0xc   :  { %88 = vrot.lane.b32.xlu1 %v41_v8, %s462_s13  ;;  %84 = vrot.lane.b32.xlu0 %v37_v9, %s462_s13  ;;  %v76_v30 = vadd.f32 %v64_v20, %v500_v13  ;;  %v79_v43 = vadd.f32 %v67_v33, %v509_v16  ;;  %v80_v56 = vadd.f32 %v68_v39, %v515_v17  ;;  %p445_p3 = por %p444_p2, %p443_p1 }
   0xd   :  { %v81_v57 = vadd.f32 %v69_v40, %v521_v22  ;;  %v77_v58 = vadd.f32 %v65_v41, %v526_v23  ;;  %v78_v4 = vadd.f32 %v66_v46, %v533_v25 }
   0xe   :  { %p446_p4 = pnand %p445_p3, %p439_p0 }
  0x10   :  { %92 = vrot.lane.b32.xlu1 %v45_v11, %s462_s13  ;;  %90 = vrot.lane.b32.xlu0 %v33_v12, %s462_s13 }
  0x14   :  { %153 = vrot.lane.b32.xlu1 %v37_v9, %s463_s14  ;;  %151 = vrot.lane.b32.xlu0 %v25_v7, %s463_s14 }
  0x18   :  { %157 = vrot.lane.b32.xlu1 %v41_v8, %s463_s14  ;;  %155 = vrot.lane.b32.xlu0 %v29_v6, %s463_s14 }
  0x1c   :  { %161 = vrot.lane.b32.xlu1 %v45_v11, %s463_s14  ;;  %159 = vrot.lane.b32.xlu0 %v33_v12, %s463_s14 }
  0x20   :  { %220 = vrot.lane.b32.xlu1 %v37_v9, %s464_s1  ;;  %218 = vrot.lane.b32.xlu0 %v25_v7, %s464_s1 }
  0x24   :  { %224 = vrot.lane.b32.xlu1 %v41_v8, %s464_s1  ;;  %222 = vrot.lane.b32.xlu0 %v29_v6, %s464_s1 }
  0x28   :  { %228 = vrot.lane.b32.xlu1 %v45_v11, %s464_s1  ;;  %226 = vrot.lane.b32.xlu0 %v33_v12, %s464_s1 }
  0x2c   :  { %287 = vrot.lane.b32.xlu1 %v37_v9, %s465_s15  ;;  %285 = vrot.lane.b32.xlu0 %v25_v7, %s465_s15 }
  0x30   :  { %291 = vrot.lane.b32.xlu1 %v41_v8, %s465_s15  ;;  %289 = vrot.lane.b32.xlu0 %v29_v6, %s465_s15 }
  0x34   :  { %295 = vrot.lane.b32.xlu1 %v45_v11, %s465_s15  ;;  %293 = vrot.lane.b32.xlu0 %v33_v12, %s465_s15 }
  0x7a   :  { %v87_v18 = vpop.permute.xlu1 %86  ;;  %v83_v19 = vpop.permute.xlu0 %82 }
  0x7b   :  { %v99_v24 = vsel %vm96_vm0, %v83_v19, %v87_v18 }
  0x7c   :  { %v109_v26 = vrot.slane %v99_v24, 7 }
  0x7e   :  { %v121_v31 = vmul.f32 %v109_v26, %v500_v13  ;;  %v89_v32 = vpop.permute.xlu1 %88  ;;  %v85_v34 = vpop.permute.xlu0 %84 }
  0x7f   :  { %v100_v36 = vsel %vm96_vm0, %v85_v34, %v89_v32 }
  0x80   :  { %v133_v37 = vrot.slane %v121_v31, 4  ;;  %v112_v38 = vrot.slane %v100_v36, 7 }
  0x82   :  { %v145_v42 = vadd.f32 %v133_v37, %v76_v30  ;;  %v124_v44 = vmul.f32 %v112_v38, %v509_v16  ;;  %v93_v45 = vpop.permute.xlu1 %92  ;;  %v91_v47 = vpop.permute.xlu0 %90 }
  0x83   :  { %v98_v48 = vsel %vm96_vm0, %v89_v32, %v93_v45  ;;  %v102_v49 = vsel %vm96_vm0, %v93_v45, %v85_v34  ;;  %v97_v50 = vsel %vm96_vm0, %v87_v18, %v91_v47  ;;  %v101_v51 = vsel %vm96_vm0, %v91_v47, %v83_v19 }
  0x84   :  { %v136_v52 = vrot.slane %v124_v44, 4  ;;  %v113_v53 = vrot.slane %v98_v48, 7  ;;  %v114_v54 = vrot.slane %v102_v49, 7  ;;  %v110_v55 = vrot.slane %v97_v50, 7 }
  0x85   :  { %v111_v59 = vrot.slane %v101_v51, 7 }
  0x86   :  { %v148_v60 = vadd.f32 %v136_v52, %v79_v43  ;;  %v125_v61 = vmul.f32 %v113_v53, %v515_v17  ;;  %v126_v62 = vmul.f32 %v114_v54, %v521_v22  ;;  %v122_v63 = vmul.f32 %v110_v55, %v526_v23  ;;  %v154_v2 = vpop.permute.xlu1 %153  ;;  %v152_v3 = vpop.permute.xlu0 %151 }
  0x87   :  { %v123_v5 = vmul.f32 %v111_v59, %v533_v25 }
  0x88   :  { %v137_v6 = vrot.slane %v125_v61, 4  ;;  %v138_v7 = vrot.slane %v126_v62, 4  ;;  %v134_v8 = vrot.slane %v122_v63, 4 }
  0x89   :  { %v135_v9 = vrot.slane %v123_v5, 4 }
  0x8a   :  { %v149_v10 = vadd.f32 %v137_v6, %v80_v56  ;;  %v150_v11 = vadd.f32 %v138_v7, %v81_v57  ;;  %v146_v12 = vadd.f32 %v134_v8, %v77_v58  ;;  %v158_v15 = vpop.permute.xlu1 %157  ;;  %v156_v18 = vpop.permute.xlu0 %155 }
  0x8b   :  { %v147_v19 = vadd.f32 %v135_v9, %v78_v4  ;;  %v167_v20 = vsel %vm163_vm1, %v154_v2, %v158_v15  ;;  %v166_v21 = vsel %vm163_vm1, %v152_v3, %v156_v18 }
  0x8c   :  { %v179_v24 = vrot.slane %v167_v20, 6  ;;  %v176_v26 = vrot.slane %v166_v21, 6 }
  0x8e   :  { %v191_v27 = vmul.f32 %v179_v24, %v509_v16  ;;  %v188_v28 = vmul.f32 %v176_v26, %v500_v13  ;;  %v162_v29 = vpop.permute.xlu1 %161  ;;  %v160_v30 = vpop.permute.xlu0 %159 }
  0x8f   :  { %v165_v31 = vsel %vm163_vm1, %v158_v15, %v162_v29  ;;  %v169_v32 = vsel %vm163_vm1, %v162_v29, %v154_v2  ;;  %v164_v33 = vsel %vm163_vm1, %v156_v18, %v160_v30  ;;  %v168_v34 = vsel %vm163_vm1, %v160_v30, %v152_v3 }
  0x90   :  { %v203_v35 = vrot.slane %v191_v27, 5  ;;  %v200_v36 = vrot.slane %v188_v28, 5  ;;  %v180_v37 = vrot.slane %v165_v31, 6  ;;  %v181_v38 = vrot.slane %v169_v32, 6 }
  0x91   :  { %v177_v39 = vrot.slane %v164_v33, 6  ;;  %v178_v40 = vrot.slane %v168_v34, 6 }
  0x92   :  { %v215_v41 = vadd.f32 %v203_v35, %v148_v60  ;;  %v212_v43 = vadd.f32 %v200_v36, %v145_v42  ;;  %v192_v44 = vmul.f32 %v180_v37, %v515_v17  ;;  %v193_v45 = vmul.f32 %v181_v38, %v521_v22  ;;  %v221_v46 = vpop.permute.xlu1 %220  ;;  %v219_v47 = vpop.permute.xlu0 %218 }
  0x93   :  { %v189_v48 = vmul.f32 %v177_v39, %v526_v23  ;;  %v190_v49 = vmul.f32 %v178_v40, %v533_v25 }
  0x94   :  { %v204_v50 = vrot.slane %v192_v44, 5  ;;  %v205_v51 = vrot.slane %v193_v45, 5 }
  0x95   :  { %v201_v52 = vrot.slane %v189_v48, 5  ;;  %v202_v53 = vrot.slane %v190_v49, 5 }
  0x96   :  { %v216_v54 = vadd.f32 %v204_v50, %v149_v10  ;;  %v217_v55 = vadd.f32 %v205_v51, %v150_v11  ;;  %v225_v56 = vpop.permute.xlu1 %224  ;;  %v223_v42 = vpop.permute.xlu0 %222 }
  0x97   :  { %v213_v57 = vadd.f32 %v201_v52, %v146_v12  ;;  %v214_v58 = vadd.f32 %v202_v53, %v147_v19  ;;  %v234_v59 = vsel %vm230_vm2, %v221_v46, %v225_v56  ;;  %v233_v60 = vsel %vm230_vm2, %v219_v47, %v223_v42 }
  0x98   :  { %v247_v61 = vrot.slane %v234_v59, 5  ;;  %v244_v62 = vrot.slane %v233_v60, 5 }
  0x9a   :  { %v259_v63 = vmul.f32 %v247_v61, %v515_v17  ;;  %v256_v2 = vmul.f32 %v244_v62, %v526_v23  ;;  %v229_v3 = vpop.permute.xlu1 %228  ;;  %v227_v4 = vpop.permute.xlu0 %226 }
  0x9b   :  { %v232_v5 = vsel %vm230_vm2, %v225_v56, %v229_v3  ;;  %v236_v6 = vsel %vm230_vm2, %v229_v3, %v221_v46  ;;  %v231_v7 = vsel %vm230_vm2, %v223_v42, %v227_v4  ;;  %v235_v8 = vsel %vm230_vm2, %v227_v4, %v219_v47 }
  0x9c   :  { %v271_v9 = vrot.slane %v259_v63, 6  ;;  %v268_v10 = vrot.slane %v256_v2, 6  ;;  %v246_v11 = vrot.slane %v236_v6, 5  ;;  %v248_v12 = vrot.slane %v232_v5, 5 }
  0x9d   :  { %v243_v15 = vrot.slane %v235_v8, 5  ;;  %v245_v18 = vrot.slane %v231_v7, 5  ;;  %v466_v47 = vmov 1966171168  }
  0x9e   :  { %v283_v19 = vadd.f32 %v271_v9, %v216_v54  ;;  %v280_v20 = vadd.f32 %v268_v10, %v213_v57  ;;  %v258_v21 = vmul.f32 %v246_v11, %v509_v16  ;;  %v260_v24 = vmul.f32 %v248_v12, %v521_v22  ;;  %v288_v26 = vpop.permute.xlu1 %287  ;;  %v286_v27 = vpop.permute.xlu0 %285 }
  0x9f   :  { %v255_v28 = vmul.f32 %v243_v15, %v500_v13  ;;  %v257_v29 = vmul.f32 %v245_v18, %v533_v25  ;;  %v361_v48 = vunpack.c.l.s4 %v466_v47 }
  0xa0   :  { %v270_v30 = vrot.slane %v258_v21, 6  ;;  %v272_v31 = vrot.slane %v260_v24, 6 }
  0xa1   :  { %v267_v32 = vrot.slane %v255_v28, 6  ;;  %v269_v33 = vrot.slane %v257_v29, 6  ;;  %v362_v57 = vunpack.c.0.s8 %v361_v48 }
  0xa2   :  { %v282_v34 = vadd.f32 %v270_v30, %v215_v41  ;;  %v284_v35 = vadd.f32 %v272_v31, %v217_v55  ;;  %v292_v36 = vpop.permute.xlu1 %291  ;;  %v290_v37 = vpop.permute.xlu0 %289 }
  0xa3   :  { %v279_v38 = vadd.f32 %v267_v32, %v212_v43  ;;  %v281_v39 = vadd.f32 %v269_v33, %v214_v58  ;;  %v301_v40 = vsel %vm297_vm3, %v288_v26, %v292_v36  ;;  %v300_v44 = vsel %vm297_vm3, %v286_v27, %v290_v37 }
  0xa4   :  { %v314_v45 = vrot.slane %v301_v40, 4  ;;  %v311_v46 = vrot.slane %v300_v44, 4  ;;  %v365_v6 = vsub.s32 %v362_v57, %v486_v1 }
  0xa6   :  { %v326_v49 = vmul.f32 %v314_v45, %v515_v17  ;;  %v323_v50 = vmul.f32 %v311_v46, %v526_v23  ;;  %v296_v41 = vpop.permute.xlu1 %295  ;;  %v294_v51 = vpop.permute.xlu0 %293 }
  0xa7   :  { %v299_v43 = vsel %vm297_vm3, %v292_v36, %v296_v41  ;;  %v303_v52 = vsel %vm297_vm3, %v296_v41, %v288_v26  ;;  %v298_v53 = vsel %vm297_vm3, %v290_v37, %v294_v51  ;;  %v302_v54 = vsel %vm297_vm3, %v294_v51, %v286_v27 }
  0xa8   :  { %v338_v55 = vrot.slane %v326_v49, 7  ;;  %v335_v56 = vrot.slane %v323_v50, 7  ;;  %v313_v42 = vrot.slane %v303_v52, 4  ;;  %v315_v17 = vrot.slane %v299_v43, 4 }
  0xa9   :  { %v310_v23 = vrot.slane %v302_v54, 4  ;;  %v312_v58 = vrot.slane %v298_v53, 4 }
  0xaa   :  { %v350_v59 = vadd.f32 %v338_v55, %v283_v19  ;;  %v347_v60 = vadd.f32 %v335_v56, %v280_v20  ;;  %v325_v61 = vmul.f32 %v313_v42, %v509_v16  ;;  %v327_v62 = vmul.f32 %v315_v17, %v521_v22 }
  0xab   :  { %v322_v63 = vmul.f32 %v310_v23, %v500_v13  ;;  %v324_v2 = vmul.f32 %v312_v58, %v533_v25 }
  0xac   :  { %v337_v3 = vrot.slane %v325_v61, 7  ;;  %v339_v14 = vrot.slane %v327_v62, 7 }
  0xad   :  { %v334_v4 = vrot.slane %v322_v63, 7  ;;  %v336_v5 = vrot.slane %v324_v2, 7 }
  0xae   :  { %v349_v7 = vadd.f32 %v337_v3, %v282_v34  ;;  %v351_v8 = vadd.f32 %v339_v14, %v284_v35 }
  0xaf   :  { %v346_v9 = vadd.f32 %v334_v4, %v279_v38  ;;  %v348_v10 = vadd.f32 %v336_v5, %v281_v39 }
  0xb0   :  { %v382_v11 = vcombine.high %v349_v7, %v350_v59  ;;  %v383_v12 = vcombine.high %v351_v8, %v351_v8 }
  0xb1   :  { %v358_v15 = vcombine.high %v346_v9, %v347_v60  ;;  %v359_v16 = vcombine.high %v348_v10, %v348_v10 }
  0xb2   :  { %v390_v18 = vrot.slane %v382_v11, %v365_v6  ;;  %v397_v22 = vrot.slane %v383_v12, %v365_v6 }
  0xb3   :  { %v366_v19 = vrot.slane %v358_v15, %v365_v6  ;;  %v373_v13 = vrot.slane %v359_v16, %v365_v6 }
  0xb4   :  { %v398_v25 = vcombine.high %v390_v18, %v397_v22 }
  0xb5   :  { %v374_v20 = vcombine.high %v366_v19, %v373_v13 }
  0xb6   :  { %v405_v21 = vrot.slane %v398_v25, %v365_v6 }
  0xb7   :  { %v381_v1 = vrot.slane %v374_v20, %v365_v6 }
  0xb8   :  { %413 = vst.msk [vmem:[#allocation2 + $0x3] sm:$0x7] %vm410_vm4, %v405_v21 }
  0xb9   :  { %412 = vst.msk [vmem:[#allocation2] sm:$0x7] %vm410_vm4, %v381_v1 }
  0xba   :  { %449 = shalt.err (!%p446_p4)
}
  0xbb   :  { %s450_s4 = scalar_lea.hbm %s634_s2, 96 }
  0xbc   :  { %p451_p5 = scmp.ne.s32.totalorder %s634_s2, %s450_s4  ;;  %p454_p6 = scmp.lt.u32.totalorder %s450_s4, %s634_s2 }
  0xbe   :  { %p456_p7 = pnand %p454_p6, %p451_p5 }
  0xc0   :  { %459 = shalt.err (!%p456_p7)
}
  0xc1   :  { %s468_s9 = smov 48   ;;  %s469_s10 = smov 3  }
  0xc2   :  { %425 = dma.vmem_to_hbm [thread:$0]  %s420_s28, 96, %s634_s2, [#allocation3], %s468_s9, %s468_s9, %s469_s10  }
  0xc3   :  { %460 = dma.done.wait [#allocation3], 96  }
  0xc4   :  { %461 = vsyncadd [#allocation3], 4294967200 }
  0xc5   :  { %429 = vsyncpa [#allocation3], 1 }

</bundles_post_ra>
